<compile_context>
chip_gen: v6e
topology: v6e:2x2x1
jax: 0.10.0
libtpu: 0.0.40
codegen_flags: <defaults>
</compile_context>

<pallas_src>
import jax
import jax.numpy as jnp
from jax import lax
from jax.experimental import pallas as pl
from jax.experimental.pallas import tpu as pltpu


def mlp_kernel(x_ref, w1_ref, b1_ref, w2_ref, b2_ref, o_ref):
    # x:  [tm, D_in]   bf16       w1: [D_hid, D_in]  bf16 (PyTorch layout)
    # b1: [1, D_hid]   f32        w2: [D_out, D_hid] bf16 (PyTorch layout)
    # b2: [1, D_out]   f32        o:  [tm, D_out]    f32
    x = x_ref[...]

    # layer_input: x @ W1^T  (contract last dims of both -> no wrapper transpose)
    h = lax.dot_general(
        x, w1_ref[...],
        dimension_numbers=(((1,), (1,)), ((), ())),
        preferred_element_type=jnp.float32,
    ) + b1_ref[...]

    # dropout: nn.Dropout() in eval / inference mode is the identity.
    # TODO(synk): training-mode dropout (random mask + 1/(1-p) scaling) not implemented.

    # relu
    h = jnp.maximum(h, 0.0)

    # layer_hidden: h @ W2^T  (cast activations to bf16 so the MXU runs natively)
    logits = lax.dot_general(
        h.astype(w2_ref.dtype), w2_ref[...],
        dimension_numbers=(((1,), (1,)), ((), ())),
        preferred_element_type=jnp.float32,
    ) + b2_ref[...]

    # softmax along dim=1 (feature axis) — exact f32 normalization so rows sum
    # to 1 to float rounding (approx reciprocal was the source of the failure).
    m = jnp.max(logits, axis=-1, keepdims=True)
    e = jnp.exp(logits - m)
    denom = jnp.sum(e, axis=-1, keepdims=True)
    o_ref[...] = (e / denom).astype(o_ref.dtype)


def mlp_forward(x_nchw, w1, b1, w2, b2, *, batch_tile=256):
    """x_nchw: [B, C, H, W]. w1: [D_hid, D_in], b1: [D_hid], w2: [D_out, D_hid],
    b2: [D_out] (PyTorch Linear parameter shapes; weights ideally already bf16)."""
    B = x_nchw.shape[0]
    d_in = x_nchw.shape[1] * x_nchw.shape[-2] * x_nchw.shape[-1]
    d_hid = w1.shape[0]
    d_out = w2.shape[0]

    # Flatten exactly like x.view(-1, C*H*W); activations go bf16 for the MXU.
    x2d = x_nchw.reshape(B, d_in).astype(jnp.bfloat16)
    w1 = w1.astype(jnp.bfloat16)     # no-op if weights are pre-cast at load time
    w2 = w2.astype(jnp.bfloat16)
    b1_2d = b1.astype(jnp.float32).reshape(1, d_hid)
    b2_2d = b2.astype(jnp.float32).reshape(1, d_out)

    # Batch-only grid: weights stay VMEM-resident across all batch tiles
    # (constant index_map -> DMA'd once). For small B this is one grid step.
    tm = B if B <= batch_tile else batch_tile
    grid = (pl.cdiv(B, tm),)

    return pl.pallas_call(
        mlp_kernel,
        out_shape=jax.ShapeDtypeStruct((B, d_out), jnp.float32),
        grid=grid,
        in_specs=[
            pl.BlockSpec((tm, d_in), lambda i: (i, 0)),
            pl.BlockSpec((d_hid, d_in), lambda i: (0, 0)),
            pl.BlockSpec((1, d_hid), lambda i: (0, 0)),
            pl.BlockSpec((d_out, d_hid), lambda i: (0, 0)),
            pl.BlockSpec((1, d_out), lambda i: (0, 0)),
        ],
        out_specs=pl.BlockSpec((tm, d_out), lambda i: (i, 0)),
        compiler_params=pltpu.CompilerParams(
            dimension_semantics=("parallel",),
        ),
    )(x2d, w1, b1_2d, w2, b2_2d)


def _reference(x_nchw, w1, b1, w2, b2):
    # Mirrors the kernel's bf16 storage of x / weights / intermediate activations
    # so the comparison isolates kernel correctness from quantization choice.
    B = x_nchw.shape[0]
    x = x_nchw.reshape(B, -1).astype(jnp.bfloat16).astype(jnp.float32)
    w1f = w1.astype(jnp.bfloat16).astype(jnp.float32)
    w2f = w2.astype(jnp.bfloat16).astype(jnp.float32)
    h = x @ w1f.T + b1
    h = jnp.maximum(h, 0.0)
    h = h.astype(jnp.bfloat16).astype(jnp.float32)
    logits = h @ w2f.T + b2
    return jax.nn.softmax(logits, axis=1)


if __name__ == "__main__":
    # Small shapes implied by the forward: NCHW input flattened to dim_in.
    B, C, H, W = 2, 4, 16, 16
    dim_in = C * H * W          # 1024
    dim_hidden = 32
    dim_out = 16

    key = jax.random.PRNGKey(0)
    kx, k1, k2, k3, k4 = jax.random.split(key, 5)

    x = jax.random.normal(kx, (B, C, H, W), dtype=jnp.float32)

    # Deterministic parameter init (uniform in +/- 1/sqrt(fan_in), like nn.Linear defaults).
    lim1 = 1.0 / (dim_in ** 0.5)
    lim2 = 1.0 / (dim_hidden ** 0.5)
    w1 = jax.random.uniform(k1, (dim_hidden, dim_in), jnp.float32, -lim1, lim1)
    b1 = jax.random.uniform(k2, (dim_hidden,), jnp.float32, -lim1, lim1)
    w2 = jax.random.uniform(k3, (dim_out, dim_hidden), jnp.float32, -lim2, lim2)
    b2 = jax.random.uniform(k4, (dim_out,), jnp.float32, -lim2, lim2)

    # Parameter prep (done once, not per forward call): store weights in bf16.
    w1_bf16 = w1.astype(jnp.bfloat16)
    w2_bf16 = w2.astype(jnp.bfloat16)

    out = mlp_forward(x, w1_bf16, b1, w2_bf16, b2)
    out = jax.block_until_ready(out)

    ref = _reference(x, w1, b1, w2, b2)
    assert out.shape == (B, dim_out), out.shape
    assert jnp.allclose(out, ref, atol=1e-3, rtol=1e-3), "mismatch vs reference"
    assert jnp.allclose(jnp.sum(out, axis=1), 1.0, atol=1e-3), "softmax rows must sum to 1"

    print("KERNEL_OK")
</pallas_src>

<mosaic_0001>
module attributes {stable_mosaic.version = 11 : i64} {
  func.func @mlp_kernel(%arg0: i32, %arg1: memref<2x1024xbf16, #tpu.memory_space<vmem>>, %arg2: memref<32x1024xbf16, #tpu.memory_space<vmem>>, %arg3: memref<1x32xf32, #tpu.memory_space<vmem>>, %arg4: memref<16x32xbf16, #tpu.memory_space<vmem>>, %arg5: memref<1x16xf32, #tpu.memory_space<vmem>>, %arg6: memref<2x16xf32, #tpu.memory_space<vmem>>) attributes {dimension_semantics = [#tpu.dimension_semantics<parallel>], iteration_bounds = array<i64: 1>, scalar_prefetch = 0 : i64, scratch_operands = 0 : i64, tpu.core_type = #tpu.core_type<tc>, window_params = [{transform_indices = @transform_0, window_bounds = array<i64: 2, 1024>}, {pipeline_mode = #tpu.pipeline_mode<synchronous>, transform_indices = @transform_1, window_bounds = array<i64: 32, 1024>}, {pipeline_mode = #tpu.pipeline_mode<synchronous>, transform_indices = @transform_2, window_bounds = array<i64: 1, 32>}, {pipeline_mode = #tpu.pipeline_mode<synchronous>, transform_indices = @transform_3, window_bounds = array<i64: 16, 32>}, {pipeline_mode = #tpu.pipeline_mode<synchronous>, transform_indices = @transform_4, window_bounds = array<i64: 1, 16>}, {transform_indices = @transform_5, window_bounds = array<i64: 2, 16>}]} {
    %c0 = arith.constant 0 : index
    %c0_0 = arith.constant 0 : index
    %0 = vector.load %arg1[%c0, %c0_0] : memref<2x1024xbf16, #tpu.memory_space<vmem>>, vector<2x1024xbf16>
    %c0_1 = arith.constant 0 : index
    %c0_2 = arith.constant 0 : index
    %1 = vector.load %arg2[%c0_1, %c0_2] : memref<32x1024xbf16, #tpu.memory_space<vmem>>, vector<32x1024xbf16>
    %cst = arith.constant dense<0.000000e+00> : vector<2x32xf32>
    %2 = tpu.matmul %0, %1, %cst {dimension_numbers = #tpu.dot_dimension_numbers<[1], [1], [0], [0], [0, 0, 1, 0], [], []>} : vector<2x1024xbf16>, vector<32x1024xbf16>, vector<2x32xf32> -> vector<2x32xf32>
    %c0_3 = arith.constant 0 : index
    %c0_4 = arith.constant 0 : index
    %3 = vector.load %arg3[%c0_3, %c0_4] : memref<1x32xf32, #tpu.memory_space<vmem>>, vector<1x32xf32>
    %4 = vector.broadcast %3 : vector<1x32xf32> to vector<2x32xf32>
    %5 = arith.addf %2, %4 : vector<2x32xf32>
    %cst_5 = arith.constant 0.000000e+00 : f32
    %6 = vector.broadcast %cst_5 : f32 to vector<2x32xf32>
    %7 = arith.maximumf %5, %6 : vector<2x32xf32>
    %8 = arith.truncf %7 : vector<2x32xf32> to vector<2x32xbf16>
    %c0_6 = arith.constant 0 : index
    %c0_7 = arith.constant 0 : index
    %9 = vector.load %arg4[%c0_6, %c0_7] : memref<16x32xbf16, #tpu.memory_space<vmem>>, vector<16x32xbf16>
    %cst_8 = arith.constant dense<0.000000e+00> : vector<2x16xf32>
    %10 = tpu.matmul %8, %9, %cst_8 {dimension_numbers = #tpu.dot_dimension_numbers<[1], [1], [0], [0], [0, 0, 1, 0], [], []>} : vector<2x32xbf16>, vector<16x32xbf16>, vector<2x16xf32> -> vector<2x16xf32>
    %c0_9 = arith.constant 0 : index
    %c0_10 = arith.constant 0 : index
    %11 = vector.load %arg5[%c0_9, %c0_10] : memref<1x16xf32, #tpu.memory_space<vmem>>, vector<1x16xf32>
    %12 = vector.broadcast %11 : vector<1x16xf32> to vector<2x16xf32>
    %13 = arith.addf %10, %12 : vector<2x16xf32>
    %cst_11 = arith.constant dense<0xFF800000> : vector<2xf32>
    %14 = vector.multi_reduction <maximumf>, %13, %cst_11 [1] : vector<2x16xf32> to vector<2xf32>
    %15 = vector.shape_cast %14 : vector<2xf32> to vector<2x1xf32>
    %16 = vector.broadcast %15 : vector<2x1xf32> to vector<2x16xf32>
    %17 = arith.subf %13, %16 : vector<2x16xf32>
    %18 = math.exp %17 : vector<2x16xf32>
    %cst_12 = arith.constant dense<0.000000e+00> : vector<2xf32>
    %19 = vector.multi_reduction <add>, %18, %cst_12 [1] : vector<2x16xf32> to vector<2xf32>
    %20 = vector.shape_cast %19 : vector<2xf32> to vector<2x1xf32>
    %21 = vector.broadcast %20 : vector<2x1xf32> to vector<2x16xf32>
    %22 = arith.divf %18, %21 : vector<2x16xf32>
    %c0_13 = arith.constant 0 : index
    %c0_14 = arith.constant 0 : index
    %23 = vector.load %arg6[%c0_13, %c0_14] : memref<2x16xf32, #tpu.memory_space<vmem>>, vector<2x16xf32>
    tpu.vector_store %arg6[%c0_13, %c0_14], %22 {strides = array<i32>} : memref<2x16xf32, #tpu.memory_space<vmem>>, vector<2x16xf32>,
    return
  }
  func.func @transform_0(%arg0: i32) -> (i32, i32) {
    %c0_i32 = arith.constant 0 : i32
    %c0_i32_0 = arith.constant 0 : i32
    return %arg0, %c0_i32 : i32, i32
  }
  func.func @transform_1(%arg0: i32) -> (i32, i32) {
    %c0_i32 = arith.constant 0 : i32
    %c0_i32_0 = arith.constant 0 : i32
    %c0_i32_1 = arith.constant 0 : i32
    return %c0_i32, %c0_i32_0 : i32, i32
  }
  func.func @transform_2(%arg0: i32) -> (i32, i32) {
    %c0_i32 = arith.constant 0 : i32
    %c0_i32_0 = arith.constant 0 : i32
    %c0_i32_1 = arith.constant 0 : i32
    return %c0_i32, %c0_i32_0 : i32, i32
  }
  func.func @transform_3(%arg0: i32) -> (i32, i32) {
    %c0_i32 = arith.constant 0 : i32
    %c0_i32_0 = arith.constant 0 : i32
    %c0_i32_1 = arith.constant 0 : i32
    return %c0_i32, %c0_i32_0 : i32, i32
  }
  func.func @transform_4(%arg0: i32) -> (i32, i32) {
    %c0_i32 = arith.constant 0 : i32
    %c0_i32_0 = arith.constant 0 : i32
    %c0_i32_1 = arith.constant 0 : i32
    return %c0_i32, %c0_i32_0 : i32, i32
  }
  func.func @transform_5(%arg0: i32) -> (i32, i32) {
    %c0_i32 = arith.constant 0 : i32
    %c0_i32_0 = arith.constant 0 : i32
    return %arg0, %c0_i32 : i32, i32
  }
}

</mosaic_0001>

<bundles_post_ra>
// kernel: tpu_custom_call.1
= control target key start
LH: loop header
LB: loop body
LE: loop exit
PB: predicated region body
PF: predicated region fallthrough
CT: control target
= control target key end

     0   :  { %10 = vsyncpa [#allocation3], 0  ;;  %s678_s0 = inlined_call_operand.hbm [shape: bf16[2,1024], index: 0, kind: input, shape index: {}]   ;;  %s679_s1 = inlined_call_operand.hbm [shape: bf16[32,1024], index: 1, kind: input, shape index: {}]   ;;  %s680_s2 = inlined_call_operand.vmem [shape: f32[1,32], index: 2, kind: input, shape index: {}]   ;;  %s681_s3 = inlined_call_operand.hbm [shape: bf16[16,32], index: 3, kind: input, shape index: {}]   ;;  %s682_s4 = inlined_call_operand.vmem [shape: f32[1,16], index: 4, kind: input, shape index: {}]   ;;  %s683_s5 = inlined_call_operand.hbm [shape: f32[2,16], index: 5, kind: output, shape index: {}]  }
   0x1   :  { %11 = vsyncpa [#allocation6], 0 }
   0x2   :  { %12 = vsyncpa [#allocation4], 0  ;;  %s606_s18 = smov [#allocation5]  }
   0x3   :  { %s28_s19 = sshll.u32 %s606_s18, 4  ;;  %s29_s19 = int_to_ptr.vmem [resolvable:$true] %s28_s19 }
   0x4   :  { %s528_s20 = scalar_lea.vmem %s29_s19, 2048  ;;  %p533_p1 = scmp.lt.s32.totalorder %s29_s19, %s29_s19 }
   0x5   :  { %p529_p0 = scmp.ne.s32.totalorder %s29_s19, %s528_s20  ;;  %p534_p2 = scmp.lt.s32.totalorder %s528_s20, %s528_s20 }
   0x7   :  { %p535_p3 = por %p534_p2, %p533_p1 }
   0x9   :  { %p536_p4 = pnand %p535_p3, %p529_p0 }
   0xb   :  { %539 = shalt.err (!%p536_p4)
}
   0xc   :  { %s607_s21 = smov 512   ;;  %s608_s22 = smov 32  }
   0xd   :  { %34 = dma.hbm_to_vmem [thread:$0]  %s679_s1, 2048, %s29_s19, [#allocation6], %s607_s21, %s607_s21, %s608_s22  }
   0xe   :  { %s609_s25 = smov [#allocation2]   ;;  %s610_s27 = smov [#allocation7]  }
   0xf   :  { %s19_s26 = sshll.u32 %s609_s25, 4  ;;  %s42_s28 = sshll.u32 %s610_s27, 4  ;;  %s20_s26 = int_to_ptr.vmem [resolvable:$true] %s19_s26  ;;  %s43_s28 = int_to_ptr.vmem [resolvable:$true] %s42_s28 }
  0x10   :  { %s548_s29 = scalar_lea.vmem %s20_s26, 128  ;;  %p553_p6 = scmp.lt.s32.totalorder %s20_s26, %s20_s26 }
  0x11   :  { %p549_p5 = scmp.ne.s32.totalorder %s20_s26, %s548_s29  ;;  %p554_p7 = scmp.lt.s32.totalorder %s548_s29, %s548_s29 }
  0x13   :  { %p555_p8 = por %p554_p7, %p553_p6 }
  0x15   :  { %p556_p9 = pnand %p555_p8, %p549_p5 }
  0x17   :  { %559 = shalt.err (!%p556_p9)
}
  0x18   :  { %22 = dma.hbm_to_vmem [thread:$0]  %s678_s0, 128, %s20_s26, [#allocation3]  }
  0x19   :  { %s568_s7 = scalar_lea.vmem %s43_s28, 128  ;;  %p573_p11 = scmp.lt.s32.totalorder %s43_s28, %s43_s28 }
  0x1a   :  { %p569_p10 = scmp.ne.s32.totalorder %s43_s28, %s568_s7  ;;  %p574_p12 = scmp.lt.s32.totalorder %s568_s7, %s568_s7 }
  0x1c   :  { %p575_p13 = por %p574_p12, %p573_p11 }
  0x1e   :  { %p576_p0 = pnand %p575_p13, %p569_p10 }
  0x20   :  { %579 = shalt.err (!%p576_p0)
}
  0x21   :  { %s611_s1 = smov 64   ;;  %s612_s8 = smov 4  }
  0x22   :  { %48 = dma.hbm_to_vmem [thread:$0]  %s681_s3, 128, %s43_s28, [#allocation6], %s611_s1, %s611_s1, %s612_s8  }
  0x23   :  { %600 = dma.done.wait [#allocation3], 128  }
  0x24   :  { %601 = vsyncadd [#allocation3], 4294967168 }
  0x25   :  { %602 = dma.done.wait [#allocation6], 2176  }
  0x26   :  { %603 = vsyncadd [#allocation6], 4294965120  ;;  %v90_v0 = vlaneseq  ;;  %v613_v1 = vmov 1966171168   ;;  %v70_v6 = vld [vmem:[#allocation5 + $0x40] sm:$0xff]  ;;  %v71_v8 = vld [vmem:[#allocation5 + $0x48] sm:$0xff] }
  0x27   :  { %v88_v2 = vunpack.c.l.s4 %v613_v1  ;;  %v74_v7 = vld [vmem:[#allocation5 + $0x60] sm:$0xff]  ;;  %v75_v10 = vld [vmem:[#allocation5 + $0x68] sm:$0xff]  ;;  %v61_v19 = vld [vmem:[#allocation2] sm:$0xff]  ;;  %vm399_vm0 = vcmask 261120   ;;  %v614_v53 = vmov 0.0   ;;  %vm615_vm1 = vmmov 0  }
  0x28   :  { %v91_v3 = vshrl.u32 %v90_v0, 7  ;;  %v485_v9 = vcombine.high %v70_v6, %v74_v7  ;;  %v484_v11 = vcombine.low %v70_v6, %v74_v7  ;;  %v62_v12 = vld [vmem:[#allocation5] sm:$0xff]  ;;  %v487_v14 = vcombine.high %v71_v8, %v75_v10  ;;  %v63_v17 = vld [vmem:[#allocation5 + $0x8] sm:$0xff]  ;;  %v72_v24 = vld [vmem:[#allocation5 + $0x50] sm:$0xff] }
  0x29   :  { %v89_v4 = vunpack.c.0.s8 %v88_v2  ;;  %v66_v13 = vld [vmem:[#allocation5 + $0x20] sm:$0xff]  ;;  %v486_v15 = vcombine.low %v71_v8, %v75_v10  ;;  %v67_v18 = vld [vmem:[#allocation5 + $0x28] sm:$0xff]  ;;  %v86_v21 = vcombine.high %v61_v19, %v61_v19  ;;  %v76_v25 = vld [vmem:[#allocation5 + $0x70] sm:$0xff]  ;;  %vm446_vm2 = vcmask 123904  }
  0x2a   :  { %v477_v16 = vcombine.high %v62_v12, %v66_v13  ;;  %235 = vmatprep.subr.bf16.mxu0 %v485_v9  ;;  %v479_v20 = vcombine.high %v63_v17, %v67_v18  ;;  %275 = vmatprep.subr.bf16.mxu1 %v487_v14  ;;  %v73_v27 = vld [vmem:[#allocation5 + $0x58] sm:$0xff]  ;;  %v476_v30 = vcombine.low %v62_v12, %v66_v13  ;;  %v64_v37 = vld [vmem:[#allocation5 + $0x10] sm:$0xff]  ;;  %v515_v52 = vld [vmem:[#allocation7] sm:$0xff]  }
  0x2b   :  { %v656_v5 = vsub.s32 %v89_v4, %v91_v3  ;;  %236 = vmatpush1.bf16.xpose.msra.mxu0 %v484_v11  ;;  %276 = vmatpush1.bf16.xpose.msra.mxu1 %v486_v15  ;;  %v77_v28 = vld [vmem:[#allocation5 + $0x78] sm:$0xff]  ;;  %v478_v31 = vcombine.low %v63_v17, %v67_v18  ;;  %v489_v33 = vcombine.high %v72_v24, %v76_v25  ;;  %v68_v38 = vld [vmem:[#allocation5 + $0x30] sm:$0xff]  ;;  %v404_v54 = vsel %vm399_vm0, %v515_v52, 0 }
  0x2c   :  { %237 = vmatprep.subr.bf16.mxu0 %v477_v16  ;;  %277 = vmatprep.subr.bf16.mxu1 %v479_v20  ;;  %v491_v34 = vcombine.high %v73_v27, %v77_v28  ;;  %v65_v39 = vld [vmem:[#allocation5 + $0x18] sm:$0xff]  ;;  %v488_v43 = vcombine.low %v72_v24, %v76_v25  ;;  %v490_v44 = vcombine.low %v73_v27, %v77_v28 }
  0x2d   :  { %v93_v22 = vrot.slane %v61_v19, %v656_v5  ;;  %v100_v29 = vrot.slane %v86_v21, %v656_v5  ;;  %v69_v40 = vld [vmem:[#allocation5 + $0x38] sm:$0xff]  ;;  %v481_v45 = vcombine.high %v64_v37, %v68_v38  ;;  %v480_v48 = vcombine.low %v64_v37, %v68_v38 }
  0x2e   :  { %v483_v46 = vcombine.high %v65_v39, %v69_v40  ;;  %v482_v49 = vcombine.low %v65_v39, %v69_v40  ;;  %v475_v63 = vld [vmem:[%s680_s2] ss:$0 sm:$0xff]  ;;  %s616_s2 = smov [#allocation8]  }
  0x2f   :  { %v101_v23 = vcombine.high %v93_v22, %v93_v22  ;;  %v102_v35 = vcombine.high %v100_v29, %v100_v29  ;;  %v109_v36 = vrot.slane %v93_v22, %v656_v5  ;;  %v116_v50 = vrot.slane %v100_v29, %v656_v5  ;;  %v492_v14 = vld [vmem:[%s682_s4] ss:$0 sm:$0xff]  ;;  %s465_s4 = sshll.u32 %s616_s2, 4  ;;  %s466_s4 = int_to_ptr.vmem [resolvable:$true] %s465_s4 }
  0x30   :  { %s580_s13 = scalar_lea.vmem %s466_s4, 32  ;;  %p585_p2 = scmp.lt.s32.totalorder %s466_s4, %s466_s4 }
  0x31   :  { %v123_v26 = vrot.slane %v101_v23, %v656_v5  ;;  %v130_v41 = vrot.slane %v102_v35, %v656_v5  ;;  %v131_v42 = vcombine.high %v109_v36, %v109_v36  ;;  %v132_v51 = vcombine.high %v116_v50, %v116_v50  ;;  %p581_p1 = scmp.ne.s32.totalorder %s466_s4, %s580_s13  ;;  %p586_p3 = scmp.lt.s32.totalorder %s580_s13, %s580_s13 }
  0x33   :  { %255 = vmatprep.mubr.bf16.mxu0 %v123_v26  ;;  %v133_v32 = vcombine.high %v123_v26, %v123_v26  ;;  %238 = vmatpush1.bf16.xpose.msra.mxu0 %v476_v30  ;;  %v134_v47 = vcombine.high %v130_v41, %v130_v41  ;;  %p587_p4 = por %p586_p3, %p585_p2 }
  0x34   :  { %278 = vmatpush1.bf16.xpose.msra.mxu1 %v478_v31  ;;  %315 = vmatprep.subr.bf16.mxu0 %v489_v33 }
  0x35   :  { %295 = vmatprep.mubr.bf16.mxu1 %v133_v32  ;;  %355 = vmatprep.subr.bf16.mxu1 %v491_v34  ;;  %p588_p5 = pnand %p587_p4, %p581_p1 }
  0x3a   :  { %256 = vmatmul.mubr.bf16.vlgmr.msra.gmra.mxu0 %v109_v36 }
  0x3b   :  { %296 = vmatmul.mubr.bf16.vlgmr.msra.gmra.mxu1 %v131_v42  ;;  %316 = vmatpush1.bf16.xpose.msra.mxu0 %v488_v43 }
  0x3c   :  { %356 = vmatpush1.bf16.xpose.msra.mxu1 %v490_v44  ;;  %317 = vmatprep.subr.bf16.mxu0 %v481_v45 }
  0x3d   :  { %357 = vmatprep.subr.bf16.mxu1 %v483_v46  ;;  %335 = vmatprep.mubr.bf16.mxu0 %v130_v41 }
  0x3e   :  { %375 = vmatprep.mubr.bf16.mxu1 %v134_v47 }
  0x43   :  { %318 = vmatpush1.bf16.xpose.msra.mxu0 %v480_v48 }
  0x44   :  { %358 = vmatpush1.bf16.xpose.msra.mxu1 %v482_v49  ;;  %497 = vmatprep.subr.bf16.mxu0 %v614_v53 }
  0x4a   :  { %336 = vmatmul.mubr.bf16.vlgmr.msra.gmra.mxu0 %v116_v50 }
  0x4b   :  { %376 = vmatmul.mubr.bf16.vlgmr.msra.gmra.mxu1 %v132_v51  ;;  %498 = vmatpush3.bf16.xpose.msra.mxu0 %v404_v54 }
  0x4c   :  { %499 = vmatprep.mubr.msk.bf16.mxu0 %vm615_vm1, %v614_v53 }
  0xfa   :  { %v257_v55 = vpop.f32.mrf.mxu0 }
  0xfb   :  { %v297_v56 = vpop.f32.mrf.mxu1  ;;  %v258_v0 = vadd.f32 %v475_v63, %v257_v55 }
  0xfc   :  { %v259_v57 = vpop.f32.mrf.mxu0 }
  0xfd   :  { %v299_v58 = vpop.f32.mrf.mxu1  ;;  %v298_v1 = vadd.f32 %v297_v56, %v258_v0 }
  0xfe   :  { %v260_v59 = vpop.f32.mrf.mxu0 }
  0xff   :  { %v300_v60 = vpop.f32.mrf.mxu1 }
 0x100   :  { %v261_v61 = vpop.f32.mrf.mxu0 }
 0x101   :  { %v301_v62 = vpop.f32.mrf.mxu1 }
 0x10a   :  { %v337_v2 = vpop.f32.mrf.mxu0 }
 0x10b   :  { %v338_v3 = vadd.f32 %v337_v2, %v298_v1  ;;  %v377_v4 = vpop.f32.mrf.mxu1 }
 0x10c   :  { %v339_v5 = vpop.f32.mrf.mxu0 }
 0x10d   :  { %v378_v6 = vadd.f32 %v377_v4, %v338_v3  ;;  %v379_v7 = vpop.f32.mrf.mxu1 }
 0x10e   :  { %v340_v8 = vpop.f32.mrf.mxu0 }
 0x10f   :  { %v383_v9 = vmax.f32 %v378_v6, 0.0  ;;  %v380_v10 = vpop.f32.mrf.mxu1 }
 0x110   :  { %v341_v11 = vpop.f32.mrf.mxu0 }
 0x111   :  { %v384_v12 = vpack.c.bf16 %v383_v9, %v383_v9  ;;  %v381_v13 = vpop.f32.mrf.mxu1 }
 0x113   :  { %500 = vmatmul.mubr.msk.bf16.vlgmr.msra.gmra.mxu0 %vm399_vm0, %v384_v12 }
 0x1d3   :  { %v440_v15 = vpop.f32.mrf.mxu0 }
 0x1d4   :  { %v441_v16 = vadd.f32 %v492_v14, %v440_v15 }
 0x1d5   :  { %v501_v17 = vpop.f32.mrf.mxu0 }
 0x1d6   :  { %v447_v18 = vsel %vm446_vm2, %v441_v16, -inf }
 0x1d7   :  { %448 = vmax.xlane.f32.xlu0 %v447_v18  ;;  %v443_v19 = vpop.f32.mrf.mxu0 }
 0x1d9   :  { %v502_v20 = vpop.f32.mrf.mxu0 }
 0x260   :  { %v449_v21 = vpop.xlane.xlu0 %448 }
 0x261   :  { %v450_v22 = vsub.f32 %v441_v16, %v449_v21 }
 0x263   :  { %v451_v23 = vmul.f32 1.442695, %v450_v22 }
 0x265   :  { %516 = vpow2.f32 %v451_v23 }
 0x272   :  { %v517_v24 = vpop.eup %516 }
 0x273   :  { %v453_v25 = vsel %vm446_vm2, %v517_v24, 0.0 }
 0x274   :  { %454 = vadd.xlane.f32.xlu0 %v453_v25 }
 0x2fd   :  { %v455_v26 = vpop.xlane.xlu0 %454 }
 0x2fe   :  { %518 = vrcp.f32 %v455_v26 }
 0x30b   :  { %v519_v27 = vpop.eup %518 }
 0x30c   :  { %v457_v28 = vmul.f32 %v519_v27, %v517_v24 }
 0x30e   :  { %458 = vst.msk [vmem:[#allocation8] sm:$0x3] %vm446_vm2, %v457_v28 }
 0x30f   :  { %591 = shalt.err (!%p588_p5)
}
 0x310   :  { %468 = dma.vmem_to_hbm [thread:$0]  %s466_s4, 32, %s683_s5, [#allocation4]  }
 0x311   :  { %604 = dma.done.wait [#allocation4], 32  }
 0x312   :  { %605 = vsyncadd [#allocation4], 4294967264 }
 0x313   :  { %472 = vsyncpa [#allocation3], 1 }
 0x314   :  { %473 = vsyncpa [#allocation6], 1 }
 0x315   :  { %474 = vsyncpa [#allocation4], 1 }

</bundles_post_ra>
